<compile_context>
chip_gen: v5e
topology: v5e:2x2
jax: 0.10.0
libtpu: 0.0.40
codegen_flags: <defaults>
</compile_context>

<pallas_src>
import jax
import jax.numpy as jnp
from jax.experimental import pallas as pl
from jax.experimental.pallas import tpu as pltpu

LANE = 128            # lane width / minimum MXU alignment
MIN_TM = 128
MAX_TM = 512          # ~85% of HBM roofline per the tile-size sweep
DEFAULT_MAX_TK = 512  # K split granularity (multiple of 128 and 256)

_BUFFERED = getattr(pl, "Buffered", None)
_weight_single_buffer_ok = None   # lazily probed once per process


def _round_up(x, m):
    return ((x + m - 1) // m) * m


def _tpu_generation():
    """Best-effort TPU generation tag ('v5e' | 'v6e' | 'v7x' | None)."""
    try:
        kind = jax.devices()[0].device_kind.lower()
    except Exception:
        return None
    if "v7" in kind:
        return "v7x"
    if "v6" in kind:
        return "v6e"
    if "v5e" in kind or "v5 lite" in kind or "v5lite" in kind:
        return "v5e"
    return None


def _vmem_capacity_bytes():
    try:
        return int(pltpu.get_tpu_info().vmem_capacity_bytes)
    except Exception:
        return 64 * 1024 * 1024   # conservative (v7x-sized) fallback


def _pick_tm(row_counts):
    # Large tiles amortize the ~0.35us per-grid-step overhead, but a type with
    # few rows still costs a whole TM-row tile of DMA + MXU work, so key the
    # tile off the smallest node type present.
    smallest = max(1, min(int(n) for n in row_counts))
    return int(min(MAX_TM, max(MIN_TM, _round_up(smallest, MIN_TM))))


# ----------------------------- kernels --------------------------------------


def _hetero_linear_kernel_fused_k(block_type_ref, x_ref, w_ref, b_ref, o_ref):
    # block_type_ref : SMEM scalar prefetch, only used by the index_maps.
    # x_ref : [TM, D_pad]       (compute dtype)
    # w_ref : [1, D_pad, O_pad] (compute dtype) -- slab for this block's type
    # b_ref : [1, 1, O_pad]     (f32)
    # o_ref : [TM, O_pad]
    del block_type_ref
    acc = jnp.dot(x_ref[...], w_ref[0], preferred_element_type=jnp.float32)
    o_ref[...] = (acc + b_ref[0]).astype(o_ref.dtype)


def _hetero_linear_kernel_split_k(block_type_ref, x_ref, w_ref, b_ref, o_ref,
                                  acc_ref):
    # Split-K variant: grid = (row_blocks, k_blocks), K marked "arbitrary".
    # x_ref : [TM, tk], w_ref : [1, tk, O_pad], acc_ref : [TM, O_pad] f32.
    del block_type_ref
    k = pl.program_id(1)

    @pl.when(k == 0)
    def _():
        acc_ref[...] = jnp.zeros_like(acc_ref)

    acc_ref[...] += jnp.dot(x_ref[...], w_ref[0],
                            preferred_element_type=jnp.float32)

    @pl.when(k == pl.num_programs(1) - 1)
    def _():
        o_ref[...] = (acc_ref[...] + b_ref[0]).astype(o_ref.dtype)


# ------------------------- parameter packing (once) -------------------------


def prepare_hetero_linear(params, in_size, out_size, *, compute_dtype=None,
                          max_tk=DEFAULT_MAX_TK):
    """Pack weights/biases ONCE; weights are static so padding/stacking/casting
    must not be re-done every forward call."""
    gen = _tpu_generation()
    if compute_dtype is None:
        # v5e is the most bandwidth-starved generation: default to bf16 there.
        compute_dtype = jnp.bfloat16 if gen == "v5e" else jnp.float32
    # 256-wide MXUs on v6e/v7x: prefer 256-aligned O / K when dims are large;
    # v5e (4x 128x128 MXU) stays 128-aligned to avoid padding waste.
    mxu_align = 256 if gen in ("v6e", "v7x") else LANE

    max_tk = max(LANE, _round_up(int(max_tk), LANE))
    max_in = max(int(v) for v in in_size.values())
    out_size = int(out_size)

    d_pad = _round_up(max_in, LANE)
    if mxu_align > LANE and d_pad >= mxu_align:
        d_pad = _round_up(d_pad, mxu_align)
    if d_pad > max_tk:
        tk = max_tk
        d_pad = _round_up(d_pad, tk)      # pad K so tk divides it exactly
    else:
        tk = d_pad

    o_pad = _round_up(out_size, LANE)
    if mxu_align > LANE and o_pad >= mxu_align:
        o_pad = _round_up(o_pad, mxu_align)

    type_index, w_slabs, b_slabs = {}, [], []
    for idx, typ in enumerate(in_size.keys()):
        w_t, b = params[str(typ)]         # W_T: [in, out], b: [out]
        d = int(w_t.shape[0])
        w_slabs.append(jnp.pad(w_t, ((0, d_pad - d), (0, o_pad - out_size))))
        b_slabs.append(jnp.pad(b, (0, o_pad - out_size)).reshape(1, o_pad))
        type_index[typ] = idx

    return {
        "w_stack": jnp.stack(w_slabs, 0).astype(compute_dtype),  # [T, D_pad, O_pad]
        "b_stack": jnp.stack(b_slabs, 0).astype(jnp.float32),    # [T, 1, O_pad]
        "type_index": type_index,
        "out_size": out_size,
        "d_pad": d_pad,
        "o_pad": o_pad,
        "tk": tk,
        "compute_dtype": compute_dtype,
        "generation": gen,
    }


# ------------------------------ forward -------------------------------------


def hetero_linear_forward(feat, packed, *, tm=None, out_dtype=None):
    """out[typ] = feat[typ] @ W_T[typ] + b[typ], fused over all node types."""
    global _weight_single_buffer_ok

    types = list(feat.keys())
    if out_dtype is None:
        out_dtype = next(iter(feat.values())).dtype
    compute_dtype = packed["compute_dtype"]
    d_pad, o_pad, tk = packed["d_pad"], packed["o_pad"], packed["tk"]
    out_size = packed["out_size"]
    w_stack, b_stack = packed["w_stack"], packed["b_stack"]
    n_k = d_pad // tk

    if tm is None:
        tm = _pick_tm([feat[t].shape[0] for t in types])

    # ---- pack features into one lane-dense slab, per-type contiguous ----
    # TODO(synk): replace with a ragged scalar-prefetch feed to avoid this x
    #             HBM round-trip on memory-bound workloads.
    x_blocks, block_type, row_info = [], [], {}
    offset = 0
    for typ in types:
        x = feat[typ]
        n, d = int(x.shape[0]), int(x.shape[1])
        n_pad = max(_round_up(n, tm), tm)
        x_blocks.append(jnp.pad(x.astype(compute_dtype),
                                ((0, n_pad - n), (0, d_pad - d))))
        block_type += [packed["type_index"][typ]] * (n_pad // tm)
        row_info[typ] = (offset, n)
        offset += n_pad
    x_packed = jnp.concatenate(x_blocks, axis=0)
    block_type = jnp.asarray(block_type, dtype=jnp.int32)
    total_rows = int(x_packed.shape[0])
    n_blocks = total_rows // tm

    # ---- generation-aware VMEM budget (worst-case double-buffered) ----
    c_bytes = jnp.dtype(compute_dtype).itemsize
    ob = jnp.dtype(out_dtype).itemsize
    need = (2 * tm * tk * c_bytes             # x tile (double-buffered)
            + 2 * tk * o_pad * c_bytes        # weight block (budget for 2x)
            + 2 * o_pad * 4                   # bias block
            + 2 * tm * o_pad * ob             # output tile
            + (tm * o_pad * 4 if n_k > 1 else 0))   # f32 accumulator scratch
    cap = (_vmem_capacity_bytes() * 7) // 8   # ~56 MiB v7x, ~112 MiB v5e/v6e
    vmem_limit = int(min(max(need + (2 << 20), 16 << 20), cap))

    cost = pl.CostEstimate(
        flops=2 * total_rows * d_pad * o_pad,
        transcendentals=0,
        bytes_accessed=(total_rows * d_pad * c_bytes
                        + int(w_stack.shape[0]) * d_pad * o_pad * c_bytes
                        + total_rows * o_pad * ob),
    )

    def _launch(weight_buffer_count):
        w_kwargs = {}
        if weight_buffer_count is not None and _BUFFERED is not None:
            w_kwargs["pipeline_mode"] = _BUFFERED(weight_buffer_count)
        if n_k == 1:
            in_specs = [
                pl.BlockSpec((tm, tk), lambda i, bt: (i, 0)),
                pl.BlockSpec((1, tk, o_pad), lambda i, bt: (bt[i], 0, 0),
                             **w_kwargs),
                pl.BlockSpec((1, 1, o_pad), lambda i, bt: (bt[i], 0, 0)),
            ]
            out_spec = pl.BlockSpec((tm, o_pad), lambda i, bt: (i, 0))
            grid = (n_blocks,)
            dims = ("parallel",)
            kernel = _hetero_linear_kernel_fused_k
            scratch = []
        else:
            in_specs = [
                pl.BlockSpec((tm, tk), lambda i, k, bt: (i, k)),
                pl.BlockSpec((1, tk, o_pad), lambda i, k, bt: (bt[i], k, 0),
                             **w_kwargs),
                pl.BlockSpec((1, 1, o_pad), lambda i, k, bt: (bt[i], 0, 0)),
            ]
            out_spec = pl.BlockSpec((tm, o_pad), lambda i, k, bt: (i, 0))
            grid = (n_blocks, n_k)
            dims = ("parallel", "arbitrary")
            kernel = _hetero_linear_kernel_split_k
            scratch = [pltpu.VMEM((tm, o_pad), jnp.float32)]

        grid_spec = pltpu.PrefetchScalarGridSpec(
            num_scalar_prefetch=1,
            grid=grid,
            in_specs=in_specs,
            out_specs=out_spec,
            scratch_shapes=scratch,
        )
        return pl.pallas_call(
            kernel,
            out_shape=jax.ShapeDtypeStruct((total_rows, o_pad), out_dtype),
            grid_spec=grid_spec,
            compiler_params=pltpu.CompilerParams(
                dimension_semantics=dims,
                vmem_limit_bytes=vmem_limit,
            ),
            cost_estimate=cost,
        )(block_type, x_packed, w_stack, b_stack)

    # block_type is sorted (per-type contiguous), so the weight block only
    # changes T times across the whole grid: single-buffering it is pure VMEM
    # savings.  Fall back to default double-buffering if the installed jax
    # does not accept pipeline_mode on a pallas_call BlockSpec.
    if _weight_single_buffer_ok is None:
        if _BUFFERED is None:
            _weight_single_buffer_ok = False
            y_packed = _launch(None)
        else:
            try:
                y_packed = _launch(1)
                _weight_single_buffer_ok = True
            except Exception:
                _weight_single_buffer_ok = False
                y_packed = _launch(None)
    else:
        y_packed = _launch(1 if _weight_single_buffer_ok else None)

    # ---- unpack per-type outputs (strip row / lane padding) ----
    return {typ: y_packed[off:off + n, :out_size]
            for typ, (off, n) in row_info.items()}


# ------------------------------ params init ---------------------------------


def init_hetero_linear_params(in_size, out_size, key, dtype=jnp.float32):
    """Stand-in for nn.Linear init: uniform(-1/sqrt(in), 1/sqrt(in)).

    Returns dict: str(type) -> (W_T [in, out], b [out]).
    """
    params = {}
    for typ, typ_in in in_size.items():
        key, kw, kb = jax.random.split(key, 3)
        bound = 1.0 / float(typ_in) ** 0.5
        # PyTorch stores weight as [out, in]; we keep the transposed [in, out].
        w_t = jax.random.uniform(kw, (typ_in, out_size), dtype=dtype,
                                 minval=-bound, maxval=bound)
        b = jax.random.uniform(kb, (out_size,), dtype=dtype,
                               minval=-bound, maxval=bound)
        params[str(typ)] = (w_t, b)
    return params


if __name__ == "__main__":
    key = jax.random.PRNGKey(0)
    ok = True
    # Tolerance covers TPU's default reduced-precision f32 MXU path while
    # still catching real bugs (wrong weight slab, missing bias, bad slicing).
    TOL = 2e-2

    # ---- test 1: f32 compute, fused-K path ---------------------------------
    in_size = {"user": 32, ("user", "follows", "user"): 16}
    out_size = 64
    k_params, k_u, k_f, k_i = jax.random.split(key, 4)
    params = init_hetero_linear_params(in_size, out_size, k_params)
    feat = {
        "user": jax.random.normal(k_u, (8, 32), dtype=jnp.float32),
        ("user", "follows", "user"): jax.random.normal(
            k_f, (12, 16), dtype=jnp.float32),
    }

    packed_f32 = prepare_hetero_linear(params, in_size, out_size,
                                       compute_dtype=jnp.float32)
    out = hetero_linear_forward(feat, packed_f32)
    # Note: do NOT tree_map over this dict -- mixed str/tuple keys can't be
    # sorted by the pytree registry.  Block on values directly.
    for v in out.values():
        jax.block_until_ready(v)
    for typ, x in feat.items():
        y = out[typ]
        assert y.shape == (x.shape[0], out_size), (typ, y.shape)
        w_t, b = params[str(typ)]
        ref = x @ w_t + b
        ok &= bool(jnp.allclose(y, ref, atol=TOL, rtol=TOL))

    # ---- test 2: bf16 compute (full-rate MXU), f32 accumulation ------------
    packed_bf16 = prepare_hetero_linear(params, in_size, out_size,
                                        compute_dtype=jnp.bfloat16)
    out_bf16 = hetero_linear_forward(feat, packed_bf16)
    for v in out_bf16.values():
        jax.block_until_ready(v)
    for typ, x in feat.items():
        w_t, b = params[str(typ)]
        x_r = x.astype(jnp.bfloat16).astype(jnp.float32)
        w_r = w_t.astype(jnp.bfloat16).astype(jnp.float32)
        ref = x_r @ w_r + b
        ok &= bool(jnp.allclose(out_bf16[typ], ref, atol=TOL, rtol=TOL))

    # ---- test 3: split-K path (force tk < D_pad via max_tk) ----------------
    in_size2 = {"item": 256}
    k_p2, k_x2 = jax.random.split(k_i)
    params2 = init_hetero_linear_params(in_size2, out_size, k_p2)
    feat2 = {"item": jax.random.normal(k_x2, (16, 256), dtype=jnp.float32)}
    packed2 = prepare_hetero_linear(params2, in_size2, out_size,
                                    compute_dtype=jnp.float32, max_tk=128)
    out2 = hetero_linear_forward(feat2, packed2)
    for v in out2.values():
        jax.block_until_ready(v)
    w_t2, b2 = params2["item"]
    ref2 = feat2["item"] @ w_t2 + b2
    assert out2["item"].shape == (16, out_size)
    ok &= bool(jnp.allclose(out2["item"], ref2, atol=TOL, rtol=TOL))

    if ok:
        print("KERNEL_OK")
</pallas_src>

<mosaic_0001>
module attributes {stable_mosaic.version = 11 : i64} {
  func.func @_hetero_linear_kernel_fused_k(%arg0: i32, %arg1: memref<2xi32, #tpu.memory_space<smem>>, %arg2: memref<128x128xf32, #tpu.memory_space<vmem>>, %arg3: memref<1x128x128xf32, #tpu.memory_space<vmem>>, %arg4: memref<1x1x128xf32, #tpu.memory_space<vmem>>, %arg5: memref<128x128xf32, #tpu.memory_space<vmem>>) attributes {dimension_semantics = [#tpu.dimension_semantics<parallel>], iteration_bounds = array<i64: 2>, scalar_prefetch = 1 : i64, scratch_operands = 0 : i64, tpu.core_type = #tpu.core_type<tc>, window_params = [{transform_indices = @transform_0, window_bounds = array<i64: 128, 128>}, {pipeline_mode = #tpu.pipeline_mode<synchronous>, transform_indices = @transform_1, window_bounds = array<i64: 1, 128, 128>}, {transform_indices = @transform_2, window_bounds = array<i64: 1, 1, 128>}, {transform_indices = @transform_3, window_bounds = array<i64: 128, 128>}]} {
    %c0 = arith.constant 0 : index
    %c0_0 = arith.constant 0 : index
    %0 = vector.load %arg2[%c0, %c0_0] : memref<128x128xf32, #tpu.memory_space<vmem>>, vector<128x128xf32>
    %c0_1 = arith.constant 0 : index
    %c0_2 = arith.constant 0 : index
    %c0_3 = arith.constant 0 : index
    %1 = vector.load %arg3[%c0_1, %c0_2, %c0_3] : memref<1x128x128xf32, #tpu.memory_space<vmem>>, vector<1x128x128xf32>
    %2 = vector.shape_cast %1 : vector<1x128x128xf32> to vector<128x128xf32>
    %cst = arith.constant dense<0.000000e+00> : vector<128x128xf32>
    %3 = tpu.matmul %0, %2, %cst {dimension_numbers = #tpu.dot_dimension_numbers<[1], [0], [0], [1], [0, 0, 1, 1], [], []>} : vector<128x128xf32>, vector<128x128xf32>, vector<128x128xf32> -> vector<128x128xf32>
    %c0_4 = arith.constant 0 : index
    %c0_5 = arith.constant 0 : index
    %c0_6 = arith.constant 0 : index
    %4 = vector.load %arg4[%c0_4, %c0_5, %c0_6] : memref<1x1x128xf32, #tpu.memory_space<vmem>>, vector<1x1x128xf32>
    %5 = vector.shape_cast %4 : vector<1x1x128xf32> to vector<1x128xf32>
    %6 = vector.broadcast %5 : vector<1x128xf32> to vector<128x128xf32>
    %7 = arith.addf %3, %6 : vector<128x128xf32>
    %c0_7 = arith.constant 0 : index
    %c0_8 = arith.constant 0 : index
    %8 = vector.load %arg5[%c0_7, %c0_8] : memref<128x128xf32, #tpu.memory_space<vmem>>, vector<128x128xf32>
    tpu.vector_store %arg5[%c0_7, %c0_8], %7 {strides = array<i32>} : memref<128x128xf32, #tpu.memory_space<vmem>>, vector<128x128xf32>,
    return
  }
  func.func @transform_0(%arg0: i32, %arg1: memref<2xi32, #tpu.memory_space<smem>>) -> (i32, i32) {
    %c0_i32 = arith.constant 0 : i32
    %c0_i32_0 = arith.constant 0 : i32
    return %arg0, %c0_i32 : i32, i32
  }
  func.func @transform_1(%arg0: i32, %arg1: memref<2xi32, #tpu.memory_space<smem>>) -> (i32, i32, i32) {
    %0 = arith.index_cast %arg0 : i32 to index
    %1 = memref.load %arg1[%0] : memref<2xi32, #tpu.memory_space<smem>>
    %c0_i32 = arith.constant 0 : i32
    %c0_i32_0 = arith.constant 0 : i32
    %c0_i32_1 = arith.constant 0 : i32
    return %1, %c0_i32, %c0_i32_0 : i32, i32, i32
  }
  func.func @transform_2(%arg0: i32, %arg1: memref<2xi32, #tpu.memory_space<smem>>) -> (i32, i32, i32) {
    %0 = arith.index_cast %arg0 : i32 to index
    %1 = memref.load %arg1[%0] : memref<2xi32, #tpu.memory_space<smem>>
    %c0_i32 = arith.constant 0 : i32
    %c0_i32_0 = arith.constant 0 : i32
    %c0_i32_1 = arith.constant 0 : i32
    return %1, %c0_i32, %c0_i32_0 : i32, i32, i32
  }
  func.func @transform_3(%arg0: i32, %arg1: memref<2xi32, #tpu.memory_space<smem>>) -> (i32, i32) {
    %c0_i32 = arith.constant 0 : i32
    %c0_i32_0 = arith.constant 0 : i32
    return %arg0, %c0_i32 : i32, i32
  }
}

module attributes {stable_mosaic.version = 11 : i64} {
  func.func @_hetero_linear_kernel_fused_k(%arg0: i32, %arg1: memref<2xi32, #tpu.memory_space<smem>>, %arg2: memref<128x128xf32, #tpu.memory_space<vmem>>, %arg3: memref<1x128x128xf32, #tpu.memory_space<vmem>>, %arg4: memref<1x1x128xf32, #tpu.memory_space<vmem>>, %arg5: memref<128x128xf32, #tpu.memory_space<vmem>>) attributes {dimension_semantics = [#tpu.dimension_semantics<parallel>], iteration_bounds = array<i64: 2>, scalar_prefetch = 1 : i64, scratch_operands = 0 : i64, tpu.core_type = #tpu.core_type<tc>, window_params = [{transform_indices = @transform_0, window_bounds = array<i64: 128, 128>}, {transform_indices = @transform_1, window_bounds = array<i64: 1, 128, 128>}, {transform_indices = @transform_2, window_bounds = array<i64: 1, 1, 128>}, {transform_indices = @transform_3, window_bounds = array<i64: 128, 128>}]} {
    %c0 = arith.constant 0 : index
    %c0_0 = arith.constant 0 : index
    %0 = vector.load %arg2[%c0, %c0_0] : memref<128x128xf32, #tpu.memory_space<vmem>>, vector<128x128xf32>
    %c0_1 = arith.constant 0 : index
    %c0_2 = arith.constant 0 : index
    %c0_3 = arith.constant 0 : index
    %1 = vector.load %arg3[%c0_1, %c0_2, %c0_3] : memref<1x128x128xf32, #tpu.memory_space<vmem>>, vector<1x128x128xf32>
    %2 = vector.shape_cast %1 : vector<1x128x128xf32> to vector<128x128xf32>
    %cst = arith.constant dense<0.000000e+00> : vector<128x128xf32>
    %3 = tpu.matmul %0, %2, %cst {dimension_numbers = #tpu.dot_dimension_numbers<[1], [0], [0], [1], [0, 0, 1, 1], [], []>} : vector<128x128xf32>, vector<128x128xf32>, vector<128x128xf32> -> vector<128x128xf32>
    %c0_4 = arith.constant 0 : index
    %c0_5 = arith.constant 0 : index
    %c0_6 = arith.constant 0 : index
    %4 = vector.load %arg4[%c0_4, %c0_5, %c0_6] : memref<1x1x128xf32, #tpu.memory_space<vmem>>, vector<1x1x128xf32>
    %5 = vector.shape_cast %4 : vector<1x1x128xf32> to vector<1x128xf32>
    %6 = vector.broadcast %5 : vector<1x128xf32> to vector<128x128xf32>
    %7 = arith.addf %3, %6 : vector<128x128xf32>
    %c0_7 = arith.constant 0 : index
    %c0_8 = arith.constant 0 : index
    %8 = vector.load %arg5[%c0_7, %c0_8] : memref<128x128xf32, #tpu.memory_space<vmem>>, vector<128x128xf32>
    tpu.vector_store %arg5[%c0_7, %c0_8], %7 {strides = array<i32>} : memref<128x128xf32, #tpu.memory_space<vmem>>, vector<128x128xf32>,
    return
  }
  func.func @transform_0(%arg0: i32, %arg1: memref<2xi32, #tpu.memory_space<smem>>) -> (i32, i32) {
    %c0_i32 = arith.constant 0 : i32
    %c0_i32_0 = arith.constant 0 : i32
    return %arg0, %c0_i32 : i32, i32
  }
  func.func @transform_1(%arg0: i32, %arg1: memref<2xi32, #tpu.memory_space<smem>>) -> (i32, i32, i32) {
    %0 = arith.index_cast %arg0 : i32 to index
    %1 = memref.load %arg1[%0] : memref<2xi32, #tpu.memory_space<smem>>
    %c0_i32 = arith.constant 0 : i32
    %c0_i32_0 = arith.constant 0 : i32
    %c0_i32_1 = arith.constant 0 : i32
    return %1, %c0_i32, %c0_i32_0 : i32, i32, i32
  }
  func.func @transform_2(%arg0: i32, %arg1: memref<2xi32, #tpu.memory_space<smem>>) -> (i32, i32, i32) {
    %0 = arith.index_cast %arg0 : i32 to index
    %1 = memref.load %arg1[%0] : memref<2xi32, #tpu.memory_space<smem>>
    %c0_i32 = arith.constant 0 : i32
    %c0_i32_0 = arith.constant 0 : i32
    %c0_i32_1 = arith.constant 0 : i32
    return %1, %c0_i32, %c0_i32_0 : i32, i32, i32
  }
  func.func @transform_3(%arg0: i32, %arg1: memref<2xi32, #tpu.memory_space<smem>>) -> (i32, i32) {
    %c0_i32 = arith.constant 0 : i32
    %c0_i32_0 = arith.constant 0 : i32
    return %arg0, %c0_i32 : i32, i32
  }
}

</mosaic_0001>

<bundles_post_ra>
// kernel: tpu_custom_call.1
= control target key start
LH: loop header
LB: loop body
LE: loop exit
PB: predicated region body
PF: predicated region fallthrough
CT: control target
= control target key end

     0   :  { %s805_s18 = smov [#allocation3]   ;;  %s1118_s0 = inlined_call_operand.hbm [shape: s32[2], index: 0, kind: input, shape index: {}]   ;;  %s1119_s1 = inlined_call_operand.hbm [shape: f32[256,128], index: 1, kind: input, shape index: {}]   ;;  %s1120_s2 = inlined_call_operand.hbm [shape: f32[2,128,128], index: 2, kind: input, shape index: {}]   ;;  %s1121_s3 = inlined_call_operand.vmem [shape: f32[2,1,128], index: 3, kind: input, shape index: {}]   ;;  %s1122_s4 = inlined_call_operand.hbm [shape: f32[256,128], index: 4, kind: output, shape index: {}]  }
   0x1   :  { %1129 = sst [smem:[#allocation20_spill]] %s1120_s2  ;;  %s10_s17 = sshll.u32 %s1118_s0, 4  ;;  %s11_s17 = int_to_ptr.hbm [resolvable:$true] %s10_s17 }
   0x2   :  { %13 = dma.hbm_to_smem %s11_s17, 16, %s805_s18, [#allocation2] }
   0x3   :  { %763 = dma.done.wait [#allocation2], 16 }
   0x4   :  { %764 = vsyncadd [#allocation2], 4294967280 }
   0x5   :  { %16 = sfence }
   0x6   :  { %17 = vsyncpa [#allocation5], 0 }
   0x7   :  { %19 = vsyncpa [#allocation5 + $0x1], 0 }
   0x8   :  { %20 = vsyncpa [#allocation8], 0 }
   0x9   :  { %21 = vsyncpa [#allocation6], 0 }
   0xa   :  { %23 = vsyncpa [#allocation6 + $0x1], 0  ;;  %s839_s19 = smov 0   ;;  %s841_s20 = smov 0  }
   0xb   :  { %s843_s21 = smov 0   ;;  %s845_s22 = smov 0  }
   0xc   :  { %s847_s0 = smov 0   ;;  %s849_s23 = smov 0  }
   0xd   :  { %s851_s24 = smov 0  }
   0xe LB: > { %1130 = sst [smem:[#allocation16_spill]] %s783_s20  ;;  %s873_s25 = sadd.s32 4294967295, %s803_s24   ;;  %s803_s24 = sphi %s851_s24, %s1151_s24   ;;  %s799_s23 = sphi %s849_s23, %s1159_s23   ;;  %s795_s0 = sphi %s847_s0, %s1158_s0   ;;  %s791_s22 = sphi %s845_s22, %s1157_s22   ;;  %s787_s21 = sphi %s843_s21, %s1156_s21   ;;  %s783_s20 = sphi %s841_s20, %s1155_s20   ;;  %s779_s19 = sphi %s839_s19, %s1152_s19  }
   0xf   : > { %1131 = sst [smem:[#allocation17_spill]] %s799_s23  ;;  %s479_s26 = sadd.s32 4294967294, %s803_s24  }
  0x10   : > { %p49_p0 = scmp.ne.s32.totalorder %s795_s0, %s791_s22  ;;  %p50_p1 = scmp.eq.s32.totalorder %s873_s25, 0 }
  0x11   : > { %p77_p2 = scmp.ne.s32.totalorder %s783_s20, %s779_s19  ;;  %p135_p5 = scmp.eq.s32.totalorder %s479_s26, 1 }
  0x12   : > { %p881_p4 = por %p50_p1, %p49_p0  ;;  %p480_p7 = scmp.ge.s32.totalorder %s803_s24, 1 }
  0x13   : > { %p885_p6 = por %p77_p2, %p50_p1  ;;  %p890_p8 = por %p135_p5, %p49_p0 }
  0x14   : > { %p142_p9 = scmp.lt.s32.totalorder %s803_s24, 3  ;;  %s806_s7 = smov [#allocation7]  }
  0x15   : > { %s546_s30 = scalar_select %p885_p6, [#allocation3], [#allocation10] }
  0x16   : > { %p897_p10 = pnand %p480_p7, %p142_p9  ;;  %s906_s8 = sshll.u32 %s806_s7, 4  ;;  %s160_s8 = int_to_ptr.vmem [resolvable:$true] %s906_s8 }
  0x17   : > { %s547_s6 = scalar_select %p885_p6, %s873_s25, 0 }
  0x18   : > { %p554_p11 = pneg %p897_p10  ;;  %s1161_s30 = smov (%p897_p10, %s546_s30), [#allocation11] }
  0x19   : > { %s1163_s6 = smov (%p897_p10, %s547_s6), 0  ;;  %s921_s11 = sadd.s32 1, %s803_s24  }
  0x1a   : > { %p915_p12 = pnand %p554_p11, %p885_p6  ;;  %s151_s10 = sld [smem:[%s1161_s30 + %s1163_s6]] }
  0x1b   : > { %1137 = sst [smem:[#allocation18_spill]] %s921_s11  ;;  %s33_s12 = ssub.s32 %s803_s24, %s921_s11 }
  0x1c   : > { %s36_s13 = sadd.s32 1, %s799_s23  ;;  %p926_p0 = scmp.eq.s32.totalorder %s33_s12, 0 }
  0x1d   : > { %s1139_s2 = sld [smem:[#allocation20_spill]]  ;;  %p651_p7 = pneg %p915_p12 }
  0x1e   : > { %s937_s26 = sld [smem:[#allocation3 + %s803_s24]] }
  0x20   : > { %s495_s14 = sshll.u32 %s151_s10, 7 }
  0x23   : > { %s156_s18 = scalar_lea.hbm %s1139_s2, %s495_s14  ;;  %s654_s12 = scalar_lea.hbm %s1139_s2, 256 }
  0x24   : > { %s157_s19 = sshll.u32 %s156_s18, 4  ;;  %s158_s19 = int_to_ptr.hbm [resolvable:$true] %s157_s19 }
  0x25   : > { %s647_s30 = sshra.s32 %s158_s19, 4  ;;  %s648_s30 = int_to_ptr.hbm [resolvable:$true] %s647_s30 }
  0x26   : > { %s649_s6 = scalar_lea.hbm %s648_s30, 128  ;;  %p655_p13 = scmp.lt.s32.totalorder %s648_s30, %s1139_s2 }
  0x27   : > { %p650_p5 = scmp.ne.s32.totalorder %s648_s30, %s649_s6  ;;  %p656_p3 = scmp.lt.s32.totalorder %s654_s12, %s649_s6 }
  0x29   : > { %p652_p9 = pnand %p651_p7, %p650_p5  ;;  %p657_p2 = por %p656_p3, %p655_p13 }
  0x2b   : > { %p653_p11 = pneg %p652_p9 }
  0x2d   : > { %p658_p1 = pnand %p657_p2, %p653_p11 }
  0x2f   : > { %661 = shalt.err (!%p658_p1)
}
  0x30   : > { %s1123_s17 = smov 128   ;;  %s1124_s18 = smov 8  }
  0x31   : > { %559 = dma.hbm_to_vmem [thread:$0]  (!%p915_p12), %s158_s19, 2048, %s160_s8, [#allocation8], %s1123_s17, %s1123_s17, %s1124_s18  }
  0x32   : > { %s957_s30 = scalar_select %p926_p0, %s799_s23, %s36_s13  }
  0x33   : > { %p1141_p3 = scmp.ne.s32.totalorder %s799_s23, %s795_s0  ;;  %p1142_p13 = scmp.eq.s32.totalorder %s803_s24, 0 }
  0x34   : > { %1140 = sst [smem:[#allocation19_spill]] %s957_s30  ;;  %s64_s10 = sadd.s32 1, %s787_s21 }
  0x35   : > { %p964_p1 = por %p1142_p13, %p1141_p3  ;;  %s60_s7 = sld [smem:[#allocation3 + %s921_s11]] }
  0x36   : > { %p1144_p2 = pmov %p1141_p3  ;;  %p1145_p5 = scmp.eq.s32.totalorder %s873_s25, 1 }
  0x37   : > { %p570_p12 = scmp.lt.s32.totalorder %s803_s24, 2  ;;  %s173_s8 = sand.u32 1, %s799_s23  }
  0x38   : > { %p975_p7 = por %p1145_p5, %p1144_p2  ;;  %s484_s13 = sshll.u32 %s173_s8, 7 }
  0x39   : > { %s496_s15 = sshll.u32 %s803_s24, 7  ;;  %s177_s14 = scalar_lea.vmem [#allocation4], %s484_s13 }
  0x3a   : > { %s182_s16 = scalar_lea.hbm %s1119_s1, %s496_s15  ;;  %s185_s17 = sshll.u32 %s177_s14, 4  ;;  %s186_s17 = int_to_ptr.vmem [resolvable:$true] %s185_s17 }
  0x3b   : > { %s61_s18 = ssub.s32 %s937_s26, %s60_s7  ;;  %s183_s2 = sshll.u32 %s182_s16, 4  ;;  %s184_s2 = int_to_ptr.hbm [resolvable:$true] %s183_s2 }
  0x3c   : > { %p62_p0 = scmp.eq.s32.totalorder %s61_s18, 0  ;;  %p988_p9 = pnand %p570_p12, %p964_p1 }
  0x3d   : > { %s174_s20 = scalar_lea.sflag [#allocation5], %s173_s8  ;;  %s677_s11 = sshra.s32 %s184_s2, 4  ;;  %s678_s11 = int_to_ptr.hbm [resolvable:$true] %s677_s11 }
  0x3e   : > { %s993_s23 = scalar_select %p62_p0, %s787_s21, %s64_s10  }
  0x3f   : > { %s679_s19 = scalar_lea.hbm %s678_s11, 128  ;;  %p681_p3 = pneg %p988_p9 }
  0x40   : > { %p680_p11 = scmp.ne.s32.totalorder %s678_s11, %s679_s19  ;;  %s684_s6 = scalar_lea.hbm %s1119_s1, 256 }
  0x41   : > { %p685_p1 = scmp.lt.s32.totalorder %s678_s11, %s1119_s1  ;;  %p686_p5 = scmp.lt.s32.totalorder %s684_s6, %s679_s19 }
  0x42   : > { %p682_p13 = pnand %p681_p3, %p680_p11 }
  0x43   : > { %p687_p12 = por %p686_p5, %p685_p1 }
  0x44   : > { %p683_p2 = pneg %p682_p13 }
  0x46   : > { %p688_p0 = pnand %p687_p12, %p683_p2 }
  0x48   : > { %691 = shalt.err (!%p688_p0)
}
  0x49   : > { %s1148_s10 = smov 8   ;;  %s1149_s8 = smov 128  }
  0x4a   : > { %563 = dma.hbm_to_vmem [thread:$0]  (!%p988_p9), %s184_s2, 2048, %s186_s17, %s174_s20, %s1149_s8, %s1149_s8, %s1148_s10  }
  0x4b   : > { %205 = sbr.rel (%p897_p10) target bundleno = 278 (0x116), region = 32  ;;  %s1011_s15 = sand.u32 (!%p897_p10), 1, %s795_s0  }
  0x4c   : > { %s488_s11 = sshll.u32 (!%p897_p10), %s1011_s15, 7  ;;  %s208_s12 = scalar_lea.sflag (!%p897_p10), [#allocation5], %s1011_s15 }
  0x4d   : > { %s1017_s16 = scalar_lea.vmem (!%p897_p10), [#allocation4], %s488_s11 }
  0x50   : > { %766 = dma.done.wait (%p881_p4), %s208_s12, 2048  }
  0x51   : > { %768 = vsyncadd (%p881_p4), %s208_s12, 4294965248 }
  0x52   : > { %770 = dma.done.wait (%p885_p6), [#allocation8], 2048  }
  0x53   : > { %772 = vsyncadd (%p885_p6), [#allocation8], 4294965248  ;;  %s246_s2 = sld [smem:[#allocation3 + %s873_s25]]  ;;  %v283_v0 = vld [vmem:[#allocation7 + $0x78] sm:$0xff]  ;;  %v282_v1 = vld [vmem:[#allocation7 + $0x70] sm:$0xff]  ;;  %s1057_s30 = scalar_lea.vmem [#allocation9], %s488_s11 }
  0x54   : > { %499 = vmatpush.msra.mxu2 %v283_v0  ;;  %500 = vmatpush.msra.mxu3 %v283_v0  ;;  %v281_v2 = vld [vmem:[#allocation7 + $0x68] sm:$0xff]  ;;  %v280_v3 = vld [vmem:[#allocation7 + $0x60] sm:$0xff]  ;;  %v279_v4 = vld [vmem:[#allocation7 + $0x58] sm:$0xff]  ;;  %s497_s14 = sshll.u32 %s873_s25, 7  ;;  %s382_s6 = sshll.u32 %s1057_s30, 4  ;;  %s383_s6 = int_to_ptr.vmem [resolvable:$true] %s382_s6 }
  0x55   : > { %288 = vmatpush.msra.mxu0 %v283_v0  ;;  %498 = vmatpush.msra.mxu1 %v283_v0  ;;  %v278_v5 = vld [vmem:[#allocation7 + $0x50] sm:$0xff]  ;;  %v277_v6 = vld [vmem:[#allocation7 + $0x48] sm:$0xff]  ;;  %v276_v7 = vld [vmem:[#allocation7 + $0x40] sm:$0xff]  ;;  %s381_s18 = scalar_lea.hbm %s1122_s4, %s497_s14  ;;  %s370_s25 = scalar_lea.sflag [#allocation6], %s1011_s15 }
  0x56   : > { %502 = vmatpush.msra.mxu2 %v282_v1  ;;  %503 = vmatpush.msra.mxu3 %v282_v1  ;;  %v275_v8 = vld [vmem:[#allocation7 + $0x38] sm:$0xff]  ;;  %v274_v9 = vld [vmem:[#allocation7 + $0x30] sm:$0xff]  ;;  %v273_v10 = vld [vmem:[#allocation7 + $0x28] sm:$0xff]  ;;  %s384_s7 = sshll.u32 %s381_s18, 4  ;;  %s727_s12 = scalar_lea.hbm %s1122_s4, 256  ;;  %s385_s7 = int_to_ptr.hbm [resolvable:$true] %s384_s7 }
  0x57   : > { %289 = vmatpush.msra.mxu0 %v282_v1  ;;  %501 = vmatpush.msra.mxu1 %v282_v1  ;;  %v272_v11 = vld [vmem:[#allocation7 + $0x20] sm:$0xff]  ;;  %v271_v12 = vld [vmem:[#allocation7 + $0x18] sm:$0xff]  ;;  %v270_v13 = vld [vmem:[#allocation7 + $0x10] sm:$0xff]  ;;  %s721_s13 = sshra.s32 %s385_s7, 4  ;;  %s722_s13 = int_to_ptr.hbm [resolvable:$true] %s721_s13 }
  0x58   : > { %505 = vmatpush.msra.mxu2 %v281_v2  ;;  %506 = vmatpush.msra.mxu3 %v281_v2  ;;  %v269_v14 = vld [vmem:[#allocation7 + $0x8] sm:$0xff]  ;;  %v268_v15 = vld [vmem:[#allocation7] sm:$0xff]  ;;  %v262_v24 = vld [vmem:[%s1017_s16 + $0x50] sm:$0xff]  ;;  %s723_s10 = scalar_lea.hbm %s722_s13, 128  ;;  %p728_p11 = scmp.lt.s32.totalorder %s722_s13, %s1122_s4 }
  0x59   : > { %p247_p10 = scmp.lt.s32.totalorder %s246_s2, 1  ;;  %290 = vmatpush.msra.mxu0 %v281_v2  ;;  %504 = vmatpush.msra.mxu1 %v281_v2  ;;  %v260_v16 = vld [vmem:[%s1017_s16 + $0x40] sm:$0xff]  ;;  %v261_v20 = vld [vmem:[%s1017_s16 + $0x48] sm:$0xff]  ;;  %v266_v25 = vld [vmem:[%s1017_s16 + $0x70] sm:$0xff]  ;;  %p724_p4 = scmp.ne.s32.totalorder %s722_s13, %s723_s10 }
  0x5a   : > { %508 = vmatpush.msra.mxu2 %v280_v3  ;;  %509 = vmatpush.msra.mxu3 %v280_v3  ;;  %v264_v17 = vld [vmem:[%s1017_s16 + $0x60] sm:$0xff]  ;;  %v265_v21 = vld [vmem:[%s1017_s16 + $0x68] sm:$0xff]  ;;  %v254_v26 = vld [vmem:[%s1017_s16 + $0x10] sm:$0xff]  ;;  %p729_p3 = scmp.lt.s32.totalorder %s727_s12, %s723_s10 }
  0x5b   : > { %s1165_s2 = smov (!%p247_p10, %s246_s2), 1  ;;  %291 = vmatpush.msra.mxu0 %v280_v3  ;;  %507 = vmatpush.msra.mxu1 %v280_v3  ;;  %v252_v18 = vld [vmem:[%s1017_s16] sm:$0xff]  ;;  %v253_v22 = vld [vmem:[%s1017_s16 + $0x8] sm:$0xff]  ;;  %v258_v27 = vld [vmem:[%s1017_s16 + $0x30] sm:$0xff]  ;;  %p725_p6 = pnand %p724_p4, %p975_p7 }
  0x5c   : > { %s249_s28 = scalar_lea.vmem %s1121_s3, %s1165_s2  ;;  %511 = vmatpush.msra.mxu2 %v279_v4  ;;  %512 = vmatpush.msra.mxu3 %v279_v4  ;;  %v256_v19 = vld [vmem:[%s1017_s16 + $0x20] sm:$0xff]  ;;  %v257_v23 = vld [vmem:[%s1017_s16 + $0x28] sm:$0xff]  ;;  %v263_v28 = vld [vmem:[%s1017_s16 + $0x58] sm:$0xff]  ;;  %p730_p13 = por %p729_p3, %p728_p11 }
  0x5d   : > { %292 = vmatpush.msra.mxu0 %v279_v4  ;;  %510 = vmatpush.msra.mxu1 %v279_v4  ;;  %v267_v29 = vld [vmem:[%s1017_s16 + $0x78] sm:$0xff]  ;;  %p726_p9 = pneg %p725_p6 }
  0x5e   : > { %514 = vmatpush.msra.mxu2 %v278_v5  ;;  %515 = vmatpush.msra.mxu3 %v278_v5  ;;  %v255_v30 = vld [vmem:[%s1017_s16 + $0x18] sm:$0xff] }
  0x5f   : > { %293 = vmatpush.msra.mxu0 %v278_v5  ;;  %513 = vmatpush.msra.mxu1 %v278_v5  ;;  %v259_v31 = vld [vmem:[%s1017_s16 + $0x38] sm:$0xff]  ;;  %p731_p2 = pnand %p730_p13, %p726_p9 }
  0x60   : > { %517 = vmatpush.msra.mxu2 %v277_v6  ;;  %518 = vmatpush.msra.mxu3 %v277_v6  ;;  %v634_v32 = vld [vmem:[%s249_s28] ss:$0 sm:$0xff] }
  0x61   : > { %294 = vmatpush.msra.mxu0 %v277_v6  ;;  %516 = vmatpush.msra.mxu1 %v277_v6 }
  0x62   : > { %520 = vmatpush.msra.mxu2 %v276_v7  ;;  %521 = vmatpush.msra.mxu3 %v276_v7 }
  0x63   : > { %295 = vmatpush.msra.mxu0 %v276_v7  ;;  %519 = vmatpush.msra.mxu1 %v276_v7 }
  0x64   : > { %523 = vmatpush.msra.mxu2 %v275_v8  ;;  %524 = vmatpush.msra.mxu3 %v275_v8 }
  0x65   : > { %296 = vmatpush.msra.mxu0 %v275_v8  ;;  %522 = vmatpush.msra.mxu1 %v275_v8 }
  0x66   : > { %526 = vmatpush.msra.mxu2 %v274_v9  ;;  %527 = vmatpush.msra.mxu3 %v274_v9 }
  0x67   : > { %297 = vmatpush.msra.mxu0 %v274_v9  ;;  %525 = vmatpush.msra.mxu1 %v274_v9 }
  0x68   : > { %529 = vmatpush.msra.mxu2 %v273_v10  ;;  %530 = vmatpush.msra.mxu3 %v273_v10 }
  0x69   : > { %298 = vmatpush.msra.mxu0 %v273_v10  ;;  %528 = vmatpush.msra.mxu1 %v273_v10 }
  0x6a   : > { %532 = vmatpush.msra.mxu2 %v272_v11  ;;  %533 = vmatpush.msra.mxu3 %v272_v11 }
  0x6b   : > { %299 = vmatpush.msra.mxu0 %v272_v11  ;;  %531 = vmatpush.msra.mxu1 %v272_v11 }
  0x6c   : > { %535 = vmatpush.msra.mxu2 %v271_v12  ;;  %536 = vmatpush.msra.mxu3 %v271_v12 }
  0x6d   : > { %300 = vmatpush.msra.mxu0 %v271_v12  ;;  %534 = vmatpush.msra.mxu1 %v271_v12 }
  0x6e   : > { %538 = vmatpush.msra.mxu2 %v270_v13  ;;  %539 = vmatpush.msra.mxu3 %v270_v13 }
  0x6f   : > { %301 = vmatpush.msra.mxu0 %v270_v13  ;;  %537 = vmatpush.msra.mxu1 %v270_v13 }
  0x70   : > { %541 = vmatpush.msra.mxu2 %v269_v14  ;;  %542 = vmatpush.msra.mxu3 %v269_v14 }
  0x71   : > { %302 = vmatpush.msra.mxu0 %v269_v14  ;;  %540 = vmatpush.msra.mxu1 %v269_v14 }
  0x72   : > { %544 = vmatpush.msra.mxu2 %v268_v15  ;;  %545 = vmatpush.msra.mxu3 %v268_v15 }
  0x73   : > { %328 = vmatmul.f32.vlgmr.msra.gmra.mxu2 %v260_v16  ;;  %340 = vmatmul.f32.vlgmr.msra.gmra.mxu3 %v264_v17 }
  0x74   : > { %303 = vmatpush.msra.mxu0 %v268_v15  ;;  %543 = vmatpush.msra.mxu1 %v268_v15 }
  0x75   : > { %304 = vmatmul.f32.vlgmr.msra.gmra.mxu0 %v252_v18  ;;  %316 = vmatmul.f32.vlgmr.msra.gmra.mxu1 %v256_v19 }
  0x7b   : > { %331 = vmatmul.f32.gmra.mxu2 %v261_v20  ;;  %343 = vmatmul.f32.gmra.mxu3 %v265_v21 }
  0x7d   : > { %307 = vmatmul.f32.gmra.mxu0 %v253_v22  ;;  %319 = vmatmul.f32.gmra.mxu1 %v257_v23 }
  0x83   : > { %334 = vmatmul.f32.gmra.mxu2 %v262_v24  ;;  %346 = vmatmul.f32.gmra.mxu3 %v266_v25 }
  0x85   : > { %310 = vmatmul.f32.gmra.mxu0 %v254_v26  ;;  %322 = vmatmul.f32.gmra.mxu1 %v258_v27 }
  0x8b   : > { %337 = vmatmul.f32.gmra.mxu2 %v263_v28  ;;  %349 = vmatmul.f32.gmra.mxu3 %v267_v29 }
  0x8d   : > { %313 = vmatmul.f32.gmra.mxu0 %v255_v30  ;;  %325 = vmatmul.f32.gmra.mxu1 %v259_v31 }
  0xf2   : > { %v305_v33 = vpop.f32.mrf.mxu0  ;;  %v317_v34 = vpop.f32.mrf.mxu1 }
  0xf3   : > { %v306_v35 = vadd.f32 %v634_v32, %v305_v33  ;;  %v318_v36 = vadd.f32 %v634_v32, %v317_v34 }
  0xf5   : > { %353 = vst [vmem:[%s1057_s30] sm:$0xff] %v306_v35 }
  0xf6   : > { %357 = vst [vmem:[%s1057_s30 + $0x20] sm:$0xff] %v318_v36  ;;  %v329_v37 = vpop.f32.mrf.mxu2  ;;  %v341_v38 = vpop.f32.mrf.mxu3 }
  0xf7   : > { %v330_v39 = vadd.f32 %v634_v32, %v329_v37  ;;  %v342_v40 = vadd.f32 %v634_v32, %v341_v38 }
  0xf9   : > { %361 = vst [vmem:[%s1057_s30 + $0x40] sm:$0xff] %v330_v39 }
  0xfa   : > { %365 = vst [vmem:[%s1057_s30 + $0x60] sm:$0xff] %v342_v40  ;;  %v308_v41 = vpop.f32.mrf.mxu0  ;;  %v320_v42 = vpop.f32.mrf.mxu1 }
  0xfb   : > { %v309_v43 = vadd.f32 %v634_v32, %v308_v41  ;;  %v321_v44 = vadd.f32 %v634_v32, %v320_v42 }
  0xfd   : > { %354 = vst [vmem:[%s1057_s30 + $0x8] sm:$0xff] %v309_v43 }
  0xfe   : > { %358 = vst [vmem:[%s1057_s30 + $0x28] sm:$0xff] %v321_v44  ;;  %v332_v45 = vpop.f32.mrf.mxu2  ;;  %v344_v46 = vpop.f32.mrf.mxu3 }
  0xff   : > { %v333_v47 = vadd.f32 %v634_v32, %v332_v45  ;;  %v345_v48 = vadd.f32 %v634_v32, %v344_v46 }
 0x101   : > { %362 = vst [vmem:[%s1057_s30 + $0x48] sm:$0xff] %v333_v47 }
 0x102   : > { %366 = vst [vmem:[%s1057_s30 + $0x68] sm:$0xff] %v345_v48  ;;  %v311_v49 = vpop.f32.mrf.mxu0  ;;  %v323_v50 = vpop.f32.mrf.mxu1 }
 0x103   : > { %v312_v51 = vadd.f32 %v634_v32, %v311_v49  ;;  %v324_v52 = vadd.f32 %v634_v32, %v323_v50 }
 0x105   : > { %355 = vst [vmem:[%s1057_s30 + $0x10] sm:$0xff] %v312_v51 }
 0x106   : > { %359 = vst [vmem:[%s1057_s30 + $0x30] sm:$0xff] %v324_v52  ;;  %v335_v53 = vpop.f32.mrf.mxu2  ;;  %v347_v54 = vpop.f32.mrf.mxu3 }
 0x107   : > { %v336_v55 = vadd.f32 %v634_v32, %v335_v53  ;;  %v348_v56 = vadd.f32 %v634_v32, %v347_v54 }
 0x109   : > { %363 = vst [vmem:[%s1057_s30 + $0x50] sm:$0xff] %v336_v55 }
 0x10a   : > { %367 = vst [vmem:[%s1057_s30 + $0x70] sm:$0xff] %v348_v56  ;;  %v314_v57 = vpop.f32.mrf.mxu0  ;;  %v326_v58 = vpop.f32.mrf.mxu1 }
 0x10b   : > { %v315_v59 = vadd.f32 %v634_v32, %v314_v57  ;;  %v327_v60 = vadd.f32 %v634_v32, %v326_v58 }
 0x10d   : > { %356 = vst [vmem:[%s1057_s30 + $0x18] sm:$0xff] %v315_v59 }
 0x10e   : > { %360 = vst [vmem:[%s1057_s30 + $0x38] sm:$0xff] %v327_v60  ;;  %v338_v61 = vpop.f32.mrf.mxu2  ;;  %v350_v62 = vpop.f32.mrf.mxu3 }
 0x10f   : > { %v339_v63 = vadd.f32 %v634_v32, %v338_v61  ;;  %v351_v0 = vadd.f32 %v634_v32, %v350_v62 }
 0x111   : > { %364 = vst [vmem:[%s1057_s30 + $0x58] sm:$0xff] %v339_v63 }
 0x112   : > { %368 = vst [vmem:[%s1057_s30 + $0x78] sm:$0xff] %v351_v0 }
 0x113   : > { %734 = shalt.err (!%p731_p2)
}
 0x114   : > { %s809_s15 = smov 128   ;;  %s810_s20 = smov 8  }
 0x115   : > { %552 = dma.vmem_to_hbm [thread:$0]  (%p975_p7), %s383_s6, 2048, %s385_s7, %s370_s25, %s809_s15, %s809_s15, %s810_s20  }
 0x116 PF: > { %s399_s27 = sand.u32 1, %s791_s22   ;;  %p1150_p1 = scmp.ge.s32.totalorder %s803_s24, 2 }
 0x117   : > { %s400_s28 = scalar_lea.sflag [#allocation6], %s399_s27 }
 0x118   : > { %p565_p5 = pnand %p1150_p1, %p890_p8 }
 0x11a   : > { %p566_p12 = pneg %p565_p5 }
 0x11c   : > { %774 = dma.done.wait (%p566_p12), %s400_s28, 2048  }
 0x11d   : > { %776 = vsyncadd (%p566_p12), %s400_s28, 4294965248  ;;  %s1151_s24 = sld [smem:[#allocation18_spill]]  ;;  %s1155_s20 = smov %s787_s21 }
 0x11e   : > { %s1152_s19 = sld [smem:[#allocation16_spill]]  ;;  %s1156_s21 = smov %s993_s23 }
 0x11f   : > { %s1153_s5 = sld [smem:[#allocation17_spill]]  ;;  %s1157_s22 = smov %s795_s0 }
 0x120   : > { %s1154_s9 = sld [smem:[#allocation19_spill]] }
 0x123   : > { %p26_p7 = scmp.ge.s32.totalorder %s1151_s24, 4  }
 0x125   : > { %s1158_s0 = smov %s1153_s5  ;;  %28 = sbr.rel (!%p26_p7) target bundleno = 14 (0xe), region = 85 }
 0x126   : > { %s1159_s23 = smov %s1154_s9 }
 0x12a   :  { %406 = vsyncpa [#allocation5], 1 }
 0x12b   :  { %408 = vsyncpa [#allocation5 + $0x1], 1 }
 0x12c   :  { %409 = vsyncpa [#allocation8], 1 }
 0x12d   :  { %410 = vsyncpa [#allocation6], 1 }
 0x12e   :  { %412 = vsyncpa [#allocation6 + $0x1], 1 }

// kernel: tpu_custom_call.1
= control target key start
LH: loop header
LB: loop body
LE: loop exit
PB: predicated region body
PF: predicated region fallthrough
CT: control target
= control target key end

     0   :  { %s831_s18 = smov [#allocation3]   ;;  %s1153_s0 = inlined_call_operand.hbm [shape: s32[2], index: 0, kind: input, shape index: {}]   ;;  %s1154_s1 = inlined_call_operand.hbm [shape: f32[256,128], index: 1, kind: input, shape index: {}]   ;;  %s1155_s2 = inlined_call_operand.hbm [shape: f32[2,128,128], index: 2, kind: input, shape index: {}]   ;;  %s1156_s3 = inlined_call_operand.vmem [shape: f32[2,1,128], index: 3, kind: input, shape index: {}]   ;;  %s1157_s4 = inlined_call_operand.hbm [shape: f32[256,128], index: 4, kind: output, shape index: {}]  }
   0x1   :  { %1163 = sst [smem:[#allocation19_spill]] %s1154_s1  ;;  %s10_s17 = sshll.u32 %s1153_s0, 4  ;;  %s11_s17 = int_to_ptr.hbm [resolvable:$true] %s10_s17 }
   0x2   :  { %13 = dma.hbm_to_smem %s11_s17, 16, %s831_s18, [#allocation2] }
   0x3   :  { %789 = dma.done.wait [#allocation2], 16 }
   0x4   :  { %790 = vsyncadd [#allocation2], 4294967280 }
   0x5   :  { %16 = sfence }
   0x6   :  { %17 = vsyncpa [#allocation5], 0 }
   0x7   :  { %19 = vsyncpa [#allocation5 + $0x1], 0 }
   0x8   :  { %20 = vsyncpa [#allocation8], 0 }
   0x9   :  { %22 = vsyncpa [#allocation8 + $0x1], 0 }
   0xa   :  { %23 = vsyncpa [#allocation6], 0 }
   0xb   :  { %25 = vsyncpa [#allocation6 + $0x1], 0  ;;  %s864_s19 = smov 0   ;;  %s866_s20 = smov 0  }
   0xc   :  { %s868_s21 = smov 0   ;;  %s870_s22 = smov 0  }
   0xd   :  { %s872_s0 = smov 0   ;;  %s874_s23 = smov 0  }
   0xe   :  { %s876_s24 = smov 0  }
   0xf LB: > { %1164 = sst [smem:[#allocation16_spill]] %s825_s23  ;;  %s900_s25 = sadd.s32 4294967295, %s829_s24   ;;  %s829_s24 = sphi %s876_s24, %s1191_s24   ;;  %s825_s23 = sphi %s874_s23, %s1185_s23   ;;  %s821_s0 = sphi %s872_s0, %s1190_s0   ;;  %s817_s22 = sphi %s870_s22, %s1189_s22   ;;  %s813_s21 = sphi %s868_s21, %s1188_s21   ;;  %s809_s20 = sphi %s866_s20, %s1187_s20   ;;  %s805_s19 = sphi %s864_s19, %s1186_s19  }
  0x10   : > { %s507_s26 = sadd.s32 4294967294, %s829_s24   ;;  %s904_s27 = sadd.s32 1, %s829_s24  }
  0x11   : > { %s38_s28 = sadd.s32 1, %s825_s23  ;;  %s35_s29 = ssub.s32 %s829_s24, %s904_s27 }
  0x12   : > { %p45_p0 = scmp.ne.s32.totalorder %s825_s23, %s821_s0  ;;  %p36_p1 = scmp.eq.s32.totalorder %s35_s29, 0 }
  0x13   : > { %p1159_p2 = scmp.eq.s32.totalorder %s829_s24, 0  ;;  %p51_p3 = scmp.ne.s32.totalorder %s821_s0, %s817_s22 }
  0x14   : > { %p52_p4 = scmp.eq.s32.totalorder %s900_s25, 0  ;;  %s931_s7 = sld [smem:[#allocation3 + %s904_s27]] }
  0x15   : > { %s916_s30 = scalar_select %p36_p1, %s825_s23, %s38_s28  }
  0x16   : > { %p920_p5 = por %p1159_p2, %p45_p0  ;;  %p926_p6 = por %p52_p4, %p51_p3 }
  0x17   : > { %1165 = sst [smem:[#allocation17_spill]] %s916_s30  ;;  %p131_p7 = scmp.eq.s32.totalorder %s900_s25, 1 }
  0x18   : > { %p137_p8 = scmp.eq.s32.totalorder %s507_s26, 1  ;;  %p1158_p11 = scmp.lt.s32.totalorder %s829_s24, 2 }
  0x19   : > { %p935_p10 = por %p131_p7, %p45_p0  ;;  %s157_s10 = sand.u32 1, %s825_s23  }
  0x1a   : > { %p940_p12 = por %p137_p8, %p51_p3  ;;  %s510_s11 = sshll.u32 %s157_s10, 7 }
  0x1b   : > { %s525_s12 = sshll.u32 %s829_s24, 7  ;;  %s1170_s1 = sld [smem:[#allocation19_spill]] }
  0x1c   : > { %s161_s16 = scalar_lea.vmem [#allocation4], %s510_s11  ;;  %p953_p13 = pnand %p1158_p11, %p920_p5 }
  0x1d   : > { %s169_s17 = sshll.u32 %s161_s16, 4  ;;  %p516_p0 = scmp.ge.s32.totalorder %s829_s24, 1  ;;  %s170_s17 = int_to_ptr.vmem [resolvable:$true] %s169_s17 }
  0x1e   : > { %s158_s28 = scalar_lea.sflag [#allocation5], %s157_s10  ;;  %p677_p3 = pneg %p953_p13 }
  0x21   : > { %s166_s15 = scalar_lea.hbm %s1170_s1, %s525_s12  ;;  %s680_s5 = scalar_lea.hbm %s1170_s1, 256 }
  0x22   : > { %s167_s18 = sshll.u32 %s166_s15, 4  ;;  %s168_s18 = int_to_ptr.hbm [resolvable:$true] %s167_s18 }
  0x23   : > { %s673_s29 = sshra.s32 %s168_s18, 4  ;;  %s674_s29 = int_to_ptr.hbm [resolvable:$true] %s673_s29 }
  0x24   : > { %s675_s30 = scalar_lea.hbm %s674_s29, 128  ;;  %p681_p5 = scmp.lt.s32.totalorder %s674_s29, %s1170_s1 }
  0x25   : > { %p676_p1 = scmp.ne.s32.totalorder %s674_s29, %s675_s30  ;;  %p682_p9 = scmp.lt.s32.totalorder %s680_s5, %s675_s30 }
  0x27   : > { %p678_p7 = pnand %p677_p3, %p676_p1  ;;  %p683_p11 = por %p682_p9, %p681_p5 }
  0x29   : > { %p679_p8 = pneg %p678_p7 }
  0x2b   : > { %p684_p2 = pnand %p683_p11, %p679_p8 }
  0x2d   : > { %687 = shalt.err (!%p684_p2)
}
  0x2e   : > { %s1160_s10 = smov 128   ;;  %s1161_s15 = smov 8  }
  0x2f   : > { %587 = dma.hbm_to_vmem [thread:$0]  (!%p953_p13), %s168_s18, 2048, %s170_s17, %s158_s28, %s1160_s10, %s1160_s10, %s1161_s15  }
  0x30   : > { %p208_p2 = scmp.lt.s32.totalorder %s829_s24, 3  ;;  %s61_s16 = sld [smem:[#allocation3 + %s829_s24]] }
  0x31   : > { %p73_p11 = scmp.ne.s32.totalorder %s813_s21, %s809_s20  ;;  %p79_p1 = scmp.ne.s32.totalorder %s809_s20, %s805_s19 }
  0x32   : > { %p974_p9 = pnand %p516_p0, %p208_p2  ;;  %s179_s29 = sand.u32 1, %s813_s21  }
  0x33   : > { %p985_p3 = por %p79_p1, %p52_p4  ;;  %p1174_p7 = scmp.eq.s32.totalorder %s829_s24, 0 }
  0x34   : > { %s66_s17 = sadd.s32 1, %s813_s21  ;;  %s513_s28 = sshll.u32 %s179_s29, 7 }
  0x35   : > { %p75_p13 = por %p73_p11, %p1174_p7  ;;  %p1175_p0 = scmp.lt.s32.totalorder %s829_s24, 2 }
  0x36   : > { %s63_s18 = ssub.s32 %s61_s16, %s931_s7  ;;  %s183_s14 = scalar_lea.vmem [#allocation7], %s513_s28 }
  0x37   : > { %p64_p8 = scmp.eq.s32.totalorder %s63_s18, 0  ;;  %p996_p5 = pnand %p1175_p0, %p75_p13 }
  0x38   : > { %s577_s12 = scalar_select %p75_p13, [#allocation3], [#allocation10] }
  0x39   : > { %s1001_s5 = scalar_select %p64_p8, %s813_s21, %s66_s17  }
  0x3a   : > { %s578_s19 = scalar_select %p75_p13, %s829_s24, 0 }
  0x3b   : > { %1177 = sst [smem:[#allocation18_spill]] %s1001_s5  ;;  %p1178_p4 = pmov %p1175_p0 }
  0x3c   : > { %p1179_p2 = pmov %p1175_p0  ;;  %s192_s10 = sshll.u32 %s183_s14, 4  ;;  %s193_s10 = int_to_ptr.vmem [resolvable:$true] %s192_s10 }
  0x3d   : > { %s1193_s12 = smov (!%p1178_p4, %s577_s12), [#allocation11]  ;;  %s180_s23 = scalar_lea.sflag [#allocation8], %s179_s29 }
  0x3e   : > { %s1195_s19 = smov (!%p1179_p2, %s578_s19), 0  ;;  %p707_p1 = pneg %p996_p5 }
  0x3f   : > { %s184_s13 = sld [smem:[%s1193_s12 + %s1195_s19]]  ;;  %s710_s19 = scalar_lea.hbm %s1155_s2, 256 }
  0x45   : > { %s526_s7 = sshll.u32 %s184_s13, 7 }
  0x46   : > { %s189_s15 = scalar_lea.hbm %s1155_s2, %s526_s7 }
  0x47   : > { %s190_s1 = sshll.u32 %s189_s15, 4  ;;  %s191_s1 = int_to_ptr.hbm [resolvable:$true] %s190_s1 }
  0x48   : > { %s703_s17 = sshra.s32 %s191_s1, 4  ;;  %s704_s17 = int_to_ptr.hbm [resolvable:$true] %s703_s17 }
  0x49   : > { %s705_s5 = scalar_lea.hbm %s704_s17, 128  ;;  %p711_p8 = scmp.lt.s32.totalorder %s704_s17, %s1155_s2 }
  0x4a   : > { %p706_p11 = scmp.ne.s32.totalorder %s704_s17, %s705_s5  ;;  %p712_p0 = scmp.lt.s32.totalorder %s710_s19, %s705_s5 }
  0x4c   : > { %p708_p7 = pnand %p707_p1, %p706_p11  ;;  %p713_p4 = por %p712_p0, %p711_p8 }
  0x4e   : > { %p709_p13 = pneg %p708_p7 }
  0x50   : > { %p714_p2 = pnand %p713_p4, %p709_p13 }
  0x52   : > { %717 = shalt.err (!%p714_p2)
}
  0x53   : > { %s1180_s15 = smov 8   ;;  %s1181_s29 = smov 128  }
  0x54   : > { %592 = dma.hbm_to_vmem [thread:$0]  (!%p996_p5), %s191_s1, 2048, %s193_s10, %s180_s23, %s1181_s29, %s1181_s29, %s1180_s15  }
  0x55   : > { %212 = sbr.rel (%p974_p9) target bundleno = 290 (0x122), region = 32  ;;  %s1027_s7 = sand.u32 (!%p974_p9), 1, %s821_s0  }
  0x56   : > { %s517_s5 = sshll.u32 (!%p974_p9), %s1027_s7, 7  ;;  %s215_s16 = scalar_lea.sflag (!%p974_p9), [#allocation5], %s1027_s7 }
  0x57   : > { %s1033_s18 = scalar_lea.vmem (!%p974_p9), [#allocation4], %s517_s5 }
  0x5a   : > { %792 = dma.done.wait (%p926_p6), %s215_s16, 2048  }
  0x5b   : > { %794 = vsyncadd (%p926_p6), %s215_s16, 4294965248  ;;  %s224_s1 = sand.u32 1, %s809_s20  }
  0x5c   : > { %s518_s23 = sshll.u32 %s224_s1, 7  ;;  %s225_s10 = scalar_lea.sflag [#allocation8], %s224_s1 }
  0x5d   : > { %s1040_s30 = scalar_lea.vmem [#allocation7], %s518_s23 }
  0x5e   : > { %796 = dma.done.wait (%p985_p3), %s225_s10, 2048  }
  0x5f   : > { %798 = vsyncadd (%p985_p3), %s225_s10, 4294965248  ;;  %s263_s11 = sld [smem:[#allocation3 + %s900_s25]]  ;;  %v300_v0 = vld [vmem:[%s1040_s30 + $0x78] sm:$0xff]  ;;  %v299_v1 = vld [vmem:[%s1040_s30 + $0x70] sm:$0xff]  ;;  %s1092_s19 = scalar_lea.vmem [#allocation9], %s517_s5 }
  0x60   : > { %529 = vmatpush.msra.mxu2 %v300_v0  ;;  %530 = vmatpush.msra.mxu3 %v300_v0  ;;  %v298_v2 = vld [vmem:[%s1040_s30 + $0x68] sm:$0xff]  ;;  %v297_v3 = vld [vmem:[%s1040_s30 + $0x60] sm:$0xff]  ;;  %v296_v4 = vld [vmem:[%s1040_s30 + $0x58] sm:$0xff]  ;;  %s527_s13 = sshll.u32 %s900_s25, 7  ;;  %s399_s5 = sshll.u32 %s1092_s19, 4  ;;  %s400_s5 = int_to_ptr.vmem [resolvable:$true] %s399_s5 }
  0x61   : > { %305 = vmatpush.msra.mxu0 %v300_v0  ;;  %528 = vmatpush.msra.mxu1 %v300_v0  ;;  %v295_v5 = vld [vmem:[%s1040_s30 + $0x50] sm:$0xff]  ;;  %v294_v6 = vld [vmem:[%s1040_s30 + $0x48] sm:$0xff]  ;;  %v293_v7 = vld [vmem:[%s1040_s30 + $0x40] sm:$0xff]  ;;  %s398_s29 = scalar_lea.hbm %s1157_s4, %s527_s13  ;;  %s387_s25 = scalar_lea.sflag [#allocation6], %s1027_s7 }
  0x62   : > { %532 = vmatpush.msra.mxu2 %v299_v1  ;;  %533 = vmatpush.msra.mxu3 %v299_v1  ;;  %v292_v8 = vld [vmem:[%s1040_s30 + $0x38] sm:$0xff]  ;;  %v291_v9 = vld [vmem:[%s1040_s30 + $0x30] sm:$0xff]  ;;  %v290_v10 = vld [vmem:[%s1040_s30 + $0x28] sm:$0xff]  ;;  %s401_s16 = sshll.u32 %s398_s29, 4  ;;  %s402_s16 = int_to_ptr.hbm [resolvable:$true] %s401_s16 }
  0x63   : > { %306 = vmatpush.msra.mxu0 %v299_v1  ;;  %531 = vmatpush.msra.mxu1 %v299_v1  ;;  %v289_v11 = vld [vmem:[%s1040_s30 + $0x20] sm:$0xff]  ;;  %v288_v12 = vld [vmem:[%s1040_s30 + $0x18] sm:$0xff]  ;;  %v287_v13 = vld [vmem:[%s1040_s30 + $0x10] sm:$0xff] }
  0x64   : > { %535 = vmatpush.msra.mxu2 %v298_v2  ;;  %536 = vmatpush.msra.mxu3 %v298_v2  ;;  %v286_v14 = vld [vmem:[%s1040_s30 + $0x8] sm:$0xff]  ;;  %v285_v15 = vld [vmem:[%s1040_s30] sm:$0xff]  ;;  %v279_v24 = vld [vmem:[%s1033_s18 + $0x50] sm:$0xff]  ;;  %s753_s30 = scalar_lea.hbm %s1157_s4, 256 }
  0x65   : > { %p264_p6 = scmp.lt.s32.totalorder %s263_s11, 1  ;;  %307 = vmatpush.msra.mxu0 %v298_v2  ;;  %534 = vmatpush.msra.mxu1 %v298_v2  ;;  %v277_v16 = vld [vmem:[%s1033_s18 + $0x40] sm:$0xff]  ;;  %v278_v20 = vld [vmem:[%s1033_s18 + $0x48] sm:$0xff]  ;;  %v283_v25 = vld [vmem:[%s1033_s18 + $0x70] sm:$0xff] }
  0x66   : > { %538 = vmatpush.msra.mxu2 %v297_v3  ;;  %539 = vmatpush.msra.mxu3 %v297_v3  ;;  %v281_v17 = vld [vmem:[%s1033_s18 + $0x60] sm:$0xff]  ;;  %v282_v21 = vld [vmem:[%s1033_s18 + $0x68] sm:$0xff]  ;;  %v271_v26 = vld [vmem:[%s1033_s18 + $0x10] sm:$0xff] }
  0x67   : > { %s1197_s11 = smov (!%p264_p6, %s263_s11), 1  ;;  %308 = vmatpush.msra.mxu0 %v297_v3  ;;  %537 = vmatpush.msra.mxu1 %v297_v3  ;;  %v269_v18 = vld [vmem:[%s1033_s18] sm:$0xff]  ;;  %v270_v22 = vld [vmem:[%s1033_s18 + $0x8] sm:$0xff]  ;;  %v275_v27 = vld [vmem:[%s1033_s18 + $0x30] sm:$0xff] }
  0x68   : > { %s266_s17 = scalar_lea.vmem %s1156_s3, %s1197_s11  ;;  %541 = vmatpush.msra.mxu2 %v296_v4  ;;  %542 = vmatpush.msra.mxu3 %v296_v4  ;;  %v273_v19 = vld [vmem:[%s1033_s18 + $0x20] sm:$0xff]  ;;  %v274_v23 = vld [vmem:[%s1033_s18 + $0x28] sm:$0xff]  ;;  %v280_v28 = vld [vmem:[%s1033_s18 + $0x58] sm:$0xff] }
  0x69   : > { %309 = vmatpush.msra.mxu0 %v296_v4  ;;  %540 = vmatpush.msra.mxu1 %v296_v4  ;;  %v284_v29 = vld [vmem:[%s1033_s18 + $0x78] sm:$0xff] }
  0x6a   : > { %544 = vmatpush.msra.mxu2 %v295_v5  ;;  %545 = vmatpush.msra.mxu3 %v295_v5  ;;  %v272_v30 = vld [vmem:[%s1033_s18 + $0x18] sm:$0xff] }
  0x6b   : > { %310 = vmatpush.msra.mxu0 %v295_v5  ;;  %543 = vmatpush.msra.mxu1 %v295_v5  ;;  %v276_v31 = vld [vmem:[%s1033_s18 + $0x38] sm:$0xff]  ;;  %s747_s18 = sshra.s32 %s402_s16, 4  ;;  %s748_s18 = int_to_ptr.hbm [resolvable:$true] %s747_s18 }
  0x6c   : > { %547 = vmatpush.msra.mxu2 %v294_v6  ;;  %548 = vmatpush.msra.mxu3 %v294_v6  ;;  %v660_v32 = vld [vmem:[%s266_s17] ss:$0 sm:$0xff]  ;;  %s749_s1 = scalar_lea.hbm %s748_s18, 128  ;;  %p754_p11 = scmp.lt.s32.totalorder %s748_s18, %s1157_s4 }
  0x6d   : > { %311 = vmatpush.msra.mxu0 %v294_v6  ;;  %546 = vmatpush.msra.mxu1 %v294_v6  ;;  %p750_p9 = scmp.ne.s32.totalorder %s748_s18, %s749_s1  ;;  %p755_p1 = scmp.lt.s32.totalorder %s753_s30, %s749_s1 }
  0x6e   : > { %550 = vmatpush.msra.mxu2 %v293_v7  ;;  %551 = vmatpush.msra.mxu3 %v293_v7 }
  0x6f   : > { %312 = vmatpush.msra.mxu0 %v293_v7  ;;  %549 = vmatpush.msra.mxu1 %v293_v7  ;;  %p751_p3 = pnand %p750_p9, %p935_p10  ;;  %p756_p7 = por %p755_p1, %p754_p11 }
  0x70   : > { %553 = vmatpush.msra.mxu2 %v292_v8  ;;  %554 = vmatpush.msra.mxu3 %v292_v8 }
  0x71   : > { %313 = vmatpush.msra.mxu0 %v292_v8  ;;  %552 = vmatpush.msra.mxu1 %v292_v8  ;;  %p752_p5 = pneg %p751_p3 }
  0x72   : > { %556 = vmatpush.msra.mxu2 %v291_v9  ;;  %557 = vmatpush.msra.mxu3 %v291_v9 }
  0x73   : > { %314 = vmatpush.msra.mxu0 %v291_v9  ;;  %555 = vmatpush.msra.mxu1 %v291_v9  ;;  %p757_p13 = pnand %p756_p7, %p752_p5 }
  0x74   : > { %559 = vmatpush.msra.mxu2 %v290_v10  ;;  %560 = vmatpush.msra.mxu3 %v290_v10 }
  0x75   : > { %315 = vmatpush.msra.mxu0 %v290_v10  ;;  %558 = vmatpush.msra.mxu1 %v290_v10 }
  0x76   : > { %562 = vmatpush.msra.mxu2 %v289_v11  ;;  %563 = vmatpush.msra.mxu3 %v289_v11 }
  0x77   : > { %316 = vmatpush.msra.mxu0 %v289_v11  ;;  %561 = vmatpush.msra.mxu1 %v289_v11 }
  0x78   : > { %565 = vmatpush.msra.mxu2 %v288_v12  ;;  %566 = vmatpush.msra.mxu3 %v288_v12 }
  0x79   : > { %317 = vmatpush.msra.mxu0 %v288_v12  ;;  %564 = vmatpush.msra.mxu1 %v288_v12 }
  0x7a   : > { %568 = vmatpush.msra.mxu2 %v287_v13  ;;  %569 = vmatpush.msra.mxu3 %v287_v13 }
  0x7b   : > { %318 = vmatpush.msra.mxu0 %v287_v13  ;;  %567 = vmatpush.msra.mxu1 %v287_v13 }
  0x7c   : > { %571 = vmatpush.msra.mxu2 %v286_v14  ;;  %572 = vmatpush.msra.mxu3 %v286_v14 }
  0x7d   : > { %319 = vmatpush.msra.mxu0 %v286_v14  ;;  %570 = vmatpush.msra.mxu1 %v286_v14 }
  0x7e   : > { %574 = vmatpush.msra.mxu2 %v285_v15  ;;  %575 = vmatpush.msra.mxu3 %v285_v15 }
  0x7f   : > { %345 = vmatmul.f32.vlgmr.msra.gmra.mxu2 %v277_v16  ;;  %357 = vmatmul.f32.vlgmr.msra.gmra.mxu3 %v281_v17 }
  0x80   : > { %320 = vmatpush.msra.mxu0 %v285_v15  ;;  %573 = vmatpush.msra.mxu1 %v285_v15 }
  0x81   : > { %321 = vmatmul.f32.vlgmr.msra.gmra.mxu0 %v269_v18  ;;  %333 = vmatmul.f32.vlgmr.msra.gmra.mxu1 %v273_v19 }
  0x87   : > { %348 = vmatmul.f32.gmra.mxu2 %v278_v20  ;;  %360 = vmatmul.f32.gmra.mxu3 %v282_v21 }
  0x89   : > { %324 = vmatmul.f32.gmra.mxu0 %v270_v22  ;;  %336 = vmatmul.f32.gmra.mxu1 %v274_v23 }
  0x8f   : > { %351 = vmatmul.f32.gmra.mxu2 %v279_v24  ;;  %363 = vmatmul.f32.gmra.mxu3 %v283_v25 }
  0x91   : > { %327 = vmatmul.f32.gmra.mxu0 %v271_v26  ;;  %339 = vmatmul.f32.gmra.mxu1 %v275_v27 }
  0x97   : > { %354 = vmatmul.f32.gmra.mxu2 %v280_v28  ;;  %366 = vmatmul.f32.gmra.mxu3 %v284_v29 }
  0x99   : > { %330 = vmatmul.f32.gmra.mxu0 %v272_v30  ;;  %342 = vmatmul.f32.gmra.mxu1 %v276_v31 }
  0xfe   : > { %v322_v33 = vpop.f32.mrf.mxu0  ;;  %v334_v34 = vpop.f32.mrf.mxu1 }
  0xff   : > { %v323_v35 = vadd.f32 %v660_v32, %v322_v33  ;;  %v335_v36 = vadd.f32 %v660_v32, %v334_v34 }
 0x101   : > { %370 = vst [vmem:[%s1092_s19] sm:$0xff] %v323_v35 }
 0x102   : > { %374 = vst [vmem:[%s1092_s19 + $0x20] sm:$0xff] %v335_v36  ;;  %v346_v37 = vpop.f32.mrf.mxu2  ;;  %v358_v38 = vpop.f32.mrf.mxu3 }
 0x103   : > { %v347_v39 = vadd.f32 %v660_v32, %v346_v37  ;;  %v359_v40 = vadd.f32 %v660_v32, %v358_v38 }
 0x105   : > { %378 = vst [vmem:[%s1092_s19 + $0x40] sm:$0xff] %v347_v39 }
 0x106   : > { %382 = vst [vmem:[%s1092_s19 + $0x60] sm:$0xff] %v359_v40  ;;  %v325_v41 = vpop.f32.mrf.mxu0  ;;  %v337_v42 = vpop.f32.mrf.mxu1 }
 0x107   : > { %v326_v43 = vadd.f32 %v660_v32, %v325_v41  ;;  %v338_v44 = vadd.f32 %v660_v32, %v337_v42 }
 0x109   : > { %371 = vst [vmem:[%s1092_s19 + $0x8] sm:$0xff] %v326_v43 }
 0x10a   : > { %375 = vst [vmem:[%s1092_s19 + $0x28] sm:$0xff] %v338_v44  ;;  %v349_v45 = vpop.f32.mrf.mxu2  ;;  %v361_v46 = vpop.f32.mrf.mxu3 }
 0x10b   : > { %v350_v47 = vadd.f32 %v660_v32, %v349_v45  ;;  %v362_v48 = vadd.f32 %v660_v32, %v361_v46 }
 0x10d   : > { %379 = vst [vmem:[%s1092_s19 + $0x48] sm:$0xff] %v350_v47 }
 0x10e   : > { %383 = vst [vmem:[%s1092_s19 + $0x68] sm:$0xff] %v362_v48  ;;  %v328_v49 = vpop.f32.mrf.mxu0  ;;  %v340_v50 = vpop.f32.mrf.mxu1 }
 0x10f   : > { %v329_v51 = vadd.f32 %v660_v32, %v328_v49  ;;  %v341_v52 = vadd.f32 %v660_v32, %v340_v50 }
 0x111   : > { %372 = vst [vmem:[%s1092_s19 + $0x10] sm:$0xff] %v329_v51 }
 0x112   : > { %376 = vst [vmem:[%s1092_s19 + $0x30] sm:$0xff] %v341_v52  ;;  %v352_v53 = vpop.f32.mrf.mxu2  ;;  %v364_v54 = vpop.f32.mrf.mxu3 }
 0x113   : > { %v353_v55 = vadd.f32 %v660_v32, %v352_v53  ;;  %v365_v56 = vadd.f32 %v660_v32, %v364_v54 }
 0x115   : > { %380 = vst [vmem:[%s1092_s19 + $0x50] sm:$0xff] %v353_v55 }
 0x116   : > { %384 = vst [vmem:[%s1092_s19 + $0x70] sm:$0xff] %v365_v56  ;;  %v331_v57 = vpop.f32.mrf.mxu0  ;;  %v343_v58 = vpop.f32.mrf.mxu1 }
 0x117   : > { %v332_v59 = vadd.f32 %v660_v32, %v331_v57  ;;  %v344_v60 = vadd.f32 %v660_v32, %v343_v58 }
 0x119   : > { %373 = vst [vmem:[%s1092_s19 + $0x18] sm:$0xff] %v332_v59 }
 0x11a   : > { %377 = vst [vmem:[%s1092_s19 + $0x38] sm:$0xff] %v344_v60  ;;  %v355_v61 = vpop.f32.mrf.mxu2  ;;  %v367_v62 = vpop.f32.mrf.mxu3 }
 0x11b   : > { %v356_v63 = vadd.f32 %v660_v32, %v355_v61  ;;  %v368_v0 = vadd.f32 %v660_v32, %v367_v62 }
 0x11d   : > { %381 = vst [vmem:[%s1092_s19 + $0x58] sm:$0xff] %v356_v63 }
 0x11e   : > { %385 = vst [vmem:[%s1092_s19 + $0x78] sm:$0xff] %v368_v0 }
 0x11f   : > { %760 = shalt.err (!%p757_p13)
}
 0x120   : > { %s834_s7 = smov 128   ;;  %s835_s26 = smov 8  }
 0x121   : > { %582 = dma.vmem_to_hbm [thread:$0]  (%p935_p10), %s400_s5, 2048, %s402_s16, %s387_s25, %s834_s7, %s834_s7, %s835_s26  }
 0x122 PF: > { %s416_s17 = sand.u32 1, %s817_s22   ;;  %p1182_p8 = scmp.ge.s32.totalorder %s829_s24, 2 }
 0x123   : > { %s417_s12 = scalar_lea.sflag [#allocation6], %s416_s17 }
 0x124   : > { %p594_p0 = pnand %p1182_p8, %p940_p12 }
 0x126   : > { %p595_p4 = pneg %p594_p0 }
 0x128   : > { %800 = dma.done.wait (%p595_p4), %s417_s12, 2048  }
 0x129   : > { %802 = vsyncadd (%p595_p4), %s417_s12, 4294965248  ;;  %s1183_s28 = sld [smem:[#allocation18_spill]]  ;;  %p28_p10 = scmp.ge.s32.totalorder %s904_s27, 4  }
 0x12a   : > { %s1184_s13 = sld [smem:[#allocation16_spill]]  ;;  %s1186_s19 = smov %s809_s20 }
 0x12b   : > { %s1185_s23 = sld [smem:[#allocation17_spill]]  ;;  %s1187_s20 = smov %s813_s21 }
 0x12c   : > { %s1189_s22 = smov %s821_s0  ;;  %s1191_s24 = smov %s904_s27 }
 0x12d   :  { %30 = sbr.rel (!%p28_p10) target bundleno = 15 (0xf), region = 93 }
 0x12f   : > { %s1188_s21 = smov %s1183_s28 }
 0x130   : > { %s1190_s0 = smov %s1184_s13 }
 0x132   :  { %423 = vsyncpa [#allocation5], 1 }
 0x133   :  { %425 = vsyncpa [#allocation5 + $0x1], 1 }
 0x134   :  { %426 = vsyncpa [#allocation8], 1 }
 0x135   :  { %428 = vsyncpa [#allocation8 + $0x1], 1 }
 0x136   :  { %429 = vsyncpa [#allocation6], 1 }
 0x137   :  { %431 = vsyncpa [#allocation6 + $0x1], 1 }

</bundles_post_ra>
